<compile_context>
chip_gen: v5e
topology: v5e:2x2
jax: 0.10.0
libtpu: 0.0.40
codegen_flags: <defaults>
</compile_context>

<pallas_src>
import math

import jax
import jax.numpy as jnp
from jax.experimental import pallas as pl
from jax.experimental.pallas import tpu as pltpu


def _round_up(x, m):
    return ((x + m - 1) // m) * m


# ---------------------------------------------------------------------------
# Kernel
# ---------------------------------------------------------------------------
def _make_biaffine_kernel(bb, l1, d, out, ex_off):
    """Kernel processing one batch chunk of size `bb` per grid step.

    Weight layout (host-prepared):
      w_ref[:, f*d:(f+1)*d]      bilinear block for feature f (pre-transposed)
      w_ref[:, ex_off+f]         bias[1] (x2 ones-column) path for feature f
      b_ref                      matching additive row (bias[0] + corner term)
    Output block: (bb, out, L2, L1)  -> L1 rides the lane dimension.
    """

    def kernel(x1_ref, x2_ref, w_ref, b_ref, o_ref):
        x1 = x1_ref[...]                               # (bb, l1, d)
        x2 = x2_ref[...]                               # (bb, l2, d)
        x1f = x1.reshape(bb * l1, d)                   # merge leading dims only

        if out == 1:
            # ONE fused MXU matmul: bilinear block + bias[1] column together.
            full = jnp.dot(x1f, w_ref[...], preferred_element_type=jnp.float32)
            full = full + b_ref[...]                   # (bb*l1, C)
            aff = full[:, :d]                          # lane-aligned slices
            ex = full[:, ex_off:ex_off + 1]            # (bb*l1, 1)
            aff_b = aff.reshape(bb, l1, d).astype(x2.dtype)
            # (bb, l2, d) x (bb, l1, d) -> (bb, l2, l1): L1 on lanes, no wrapper
            # transpose needed afterwards.
            s = jnp.einsum("bmj,blj->bml", x2, aff_b,
                           preferred_element_type=jnp.float32)
            s = s + ex.reshape(bb, 1, l1)              # broadcast over L2
            o_ref[:, 0, :, :] = s.astype(o_ref.dtype)
        else:
            # bias[1] path once for all features (single small-N matmul).
            ex = jnp.dot(x1f, w_ref[:, ex_off:ex_off + out],
                         preferred_element_type=jnp.float32)
            ex = ex + b_ref[:, ex_off:ex_off + out]    # (bb*l1, out)
            for f in range(out):                        # static; out is small
                # Per-feature projection keeps the live f32 intermediate at
                # (bb*l1, d) instead of (bb*l1, out*d).
                aff_f = jnp.dot(x1f, w_ref[:, f * d:(f + 1) * d],
                                preferred_element_type=jnp.float32)
                aff_f = aff_f + b_ref[:, f * d:(f + 1) * d]
                aff_b = aff_f.reshape(bb, l1, d).astype(x2.dtype)
                s = jnp.einsum("bmj,blj->bml", x2, aff_b,
                               preferred_element_type=jnp.float32)
                s = s + ex[:, f].reshape(bb, 1, l1)
                o_ref[:, f, :, :] = s.astype(o_ref.dtype)

    return kernel


# ---------------------------------------------------------------------------
# Host-side weight preparation (ones-augmentation folded into the weights)
# ---------------------------------------------------------------------------
def _prepare_weights(weight, d, out, bias, compute_dtype):
    b0, b1 = bool(bias[0]), bool(bias[1])
    d1, d2 = d + b0, d + b1
    assert weight.shape == (out * d2, d1), (weight.shape, (out * d2, d1))
    wr = weight.reshape(out, d2, d1)                   # [f, j, i]

    ex_off = _round_up(max(out * d, 1), 128)           # lane-aligned bias[1] cols
    ncols = _round_up(ex_off + out, 128)

    w_dtype = compute_dtype if compute_dtype is not None else weight.dtype
    wcat = jnp.zeros((d, ncols), w_dtype)
    bcat = jnp.zeros((1, ncols), jnp.float32)

    # Bilinear blocks laid out so the in-kernel matmul needs no transpose:
    # wcat[i, f*d + j] = Wr[f, j, i]
    wm = jnp.transpose(wr[:, :d, :d], (2, 0, 1)).reshape(d, out * d)
    wcat = wcat.at[:, :out * d].set(wm.astype(w_dtype))

    if b0:                                             # x1 ones column -> additive row
        bj = wr[:, :d, d].reshape(1, out * d)
        bcat = bcat.at[:, :out * d].set(bj.astype(jnp.float32))
    if b1:                                             # x2 ones column -> extra cols
        wi = jnp.transpose(wr[:, d, :d], (1, 0))       # (d, out)
        wcat = wcat.at[:, ex_off:ex_off + out].set(wi.astype(w_dtype))
        if b0:                                         # corner term
            c = wr[:, d, d].reshape(1, out)
            bcat = bcat.at[:, ex_off:ex_off + out].set(c.astype(jnp.float32))

    return wcat, bcat, ex_off, ncols


# ---------------------------------------------------------------------------
# Generation-aware sizing
# ---------------------------------------------------------------------------
def _vmem_budget_and_limit():
    cap = 64 * 1024 * 1024                             # conservative (v7x) fallback
    try:
        cap = int(pltpu.get_tpu_info().vmem_capacity_bytes)
    except Exception:
        pass
    limit = min(int(cap * 3 // 4), 112 * 1024 * 1024)  # headroom for Mosaic internals
    budget = int(limit * 0.85)                         # block-sizing budget < limit
    return budget, limit


def _num_tensorcores():
    try:
        kind = jax.devices()[0].device_kind.lower()
    except Exception:
        return 1
    # Chips whose single JAX device spans two TensorCores (megacore / v7x).
    return 2 if any(t in kind for t in ("v7", "v4", "v5p")) else 1


def _pick_batch_block(B, L1, L2, D, C, out, in_isz, w_isz, out_isz,
                      budget, min_chunks):
    """Largest batch block whose per-grid-step VMEM footprint fits `budget`.

    Counts the double-buffered pipelined blocks (x1, x2, out, weights) AND the
    live f32 matmul intermediates (aff / ex / score tile / cast copy)."""
    fixed = 2 * (D * C) * w_isz + 2 * C * 4            # wcat + bcat (2 buffers)
    per_b = 2 * (L1 + L2) * D * in_isz                 # x1/x2 blocks (2 buffers)
    per_b += 2 * out * L2 * L1 * out_isz               # output block (2 buffers)
    if out == 1:
        per_b += L1 * C * 4                            # fused matmul result (f32)
    else:
        per_b += 2 * L1 * D * 4 + L1 * out * 4         # per-feature aff + ex (f32)
    per_b += L2 * L1 * 4 + L1 * D * in_isz             # score tile + bf16/cast copy

    avail = max(budget - fixed, per_b)
    bb = max(1, int(avail // per_b))
    if min_chunks > 1 and B >= min_chunks:
        bb = min(bb, B // min_chunks)                  # keep both TCs busy
    bb = min(bb, B)
    # Keep blocks uniform (no partial tiles).  Prime/awkward B degrades to bb=1;
    # correct but slower — padding B would be the fix if it matters.
    while B % bb:
        bb -= 1
    return bb


# ---------------------------------------------------------------------------
# Public forward
# ---------------------------------------------------------------------------
def biaffine_forward(input1, input2, weight, out_features=1, bias=(True, True),
                     batch_block=None, compute_dtype=None):
    """Pallas implementation of Biaffine.forward.

    compute_dtype=jnp.bfloat16 is recommended for production-sized D: both MXU
    contractions then run with bf16 operands (f32 accumulation preserved)."""
    B, L1, D = input1.shape
    B2, L2, D2 = input2.shape
    assert B == B2 and D == D2
    out = int(out_features)
    out_dtype = input1.dtype

    wcat, bcat, ex_off, C = _prepare_weights(weight, D, out, bias, compute_dtype)
    if compute_dtype is not None:
        input1 = input1.astype(compute_dtype)
        input2 = input2.astype(compute_dtype)

    budget, vmem_limit = _vmem_budget_and_limit()
    min_chunks = 2 if _num_tensorcores() >= 2 else 1

    if batch_block is None:
        bb = _pick_batch_block(B, L1, L2, D, C, out,
                               jnp.dtype(input1.dtype).itemsize,
                               jnp.dtype(wcat.dtype).itemsize,
                               jnp.dtype(out_dtype).itemsize,
                               budget, min_chunks)
    else:
        bb = max(1, min(int(batch_block), B))
        while B % bb:
            bb -= 1
    num_chunks = B // bb

    kernel = _make_biaffine_kernel(bb, L1, D, out, ex_off)

    y = pl.pallas_call(
        kernel,
        out_shape=jax.ShapeDtypeStruct((B, out, L2, L1), out_dtype),
        grid_spec=pltpu.PrefetchScalarGridSpec(
            num_scalar_prefetch=0,
            grid=(num_chunks,),
            in_specs=[
                pl.BlockSpec((bb, L1, D), lambda i: (i, 0, 0)),
                pl.BlockSpec((bb, L2, D), lambda i: (i, 0, 0)),
                pl.BlockSpec((D, C), lambda i: (0, 0)),
                pl.BlockSpec((1, C), lambda i: (0, 0)),
            ],
            out_specs=pl.BlockSpec((bb, out, L2, L1), lambda i: (i, 0, 0, 0)),
        ),
        compiler_params=pltpu.CompilerParams(
            dimension_semantics=("parallel",),
            vmem_limit_bytes=vmem_limit),
    )(input1, input2, wcat, bcat)

    # Kernel already emits (B, out, L2, L1): no full-tensor transpose needed.
    if out == 1:
        return y[:, 0]                                  # (B, L2, L1)
    return jnp.transpose(y, (0, 2, 3, 1))               # (B, L2, L1, out): tiny axis move


# ---------------------------------------------------------------------------
# Pure-JAX reference (matches the PyTorch forward exactly)
# ---------------------------------------------------------------------------
def biaffine_ref(input1, input2, weight, out_features=1, bias=(True, True)):
    B, L1, _ = input1.shape
    _, L2, _ = input2.shape
    if bias[0]:
        input1 = jnp.concatenate(
            [input1, jnp.ones((B, L1, 1), input1.dtype)], axis=-1)
    if bias[1]:
        input2 = jnp.concatenate(
            [input2, jnp.ones((B, L2, 1), input2.dtype)], axis=-1)
    affine = jnp.einsum("bld,od->blo", input1, weight)          # (B, L1, out*(D+b1))
    affine = affine.reshape(B, L1 * out_features, -1)           # (B, L1*out, D+b1)
    s = jnp.einsum("bjk,bmk->bjm", affine, input2)              # (B, L1*out, L2)
    s = jnp.transpose(s, (0, 2, 1)).reshape(B, L2, L1, -1)
    if out_features == 1:
        s = jnp.squeeze(s, -1)
    return s


def xavier_uniform(key, shape, dtype=jnp.float32):
    fan_out, fan_in = shape
    bound = math.sqrt(6.0 / (fan_in + fan_out))
    return jax.random.uniform(key, shape, dtype, minval=-bound, maxval=bound)


if __name__ == "__main__":
    key = jax.random.PRNGKey(0)
    k1, k2, kw1, kw2 = jax.random.split(key, 4)

    # --- main config: arc-scoring style Biaffine(in_features=32, out_features=1) ---
    B, L1, L2, D = 2, 8, 12, 32
    bias = (True, True)
    out_features = 1
    x1 = jax.random.normal(k1, (B, L1, D), dtype=jnp.float32)
    x2 = jax.random.normal(k2, (B, L2, D), dtype=jnp.float32)
    w = xavier_uniform(kw1, (out_features * (D + bias[1]), D + bias[0]))

    y = biaffine_forward(x1, x2, w, out_features=out_features, bias=bias)
    jax.block_until_ready(y)
    y_ref = biaffine_ref(x1, x2, w, out_features=out_features, bias=bias)
    assert y.shape == (B, L2, L1), y.shape
    assert jnp.allclose(y, y_ref, atol=1e-4, rtol=1e-4)

    # --- secondary config: label-scoring style Biaffine(out_features=3) ---
    out_features2 = 3
    w2 = xavier_uniform(kw2, (out_features2 * (D + bias[1]), D + bias[0]))
    y2 = biaffine_forward(x1, x2, w2, out_features=out_features2, bias=bias)
    jax.block_until_ready(y2)
    y2_ref = biaffine_ref(x1, x2, w2, out_features=out_features2, bias=bias)
    assert y2.shape == (B, L2, L1, out_features2), y2.shape
    assert jnp.allclose(y2, y2_ref, atol=1e-4, rtol=1e-4)

    # --- bf16 compute path (recommended for production D); f32 accumulation kept,
    #     so tolerance is loosened accordingly for the bf16-operand rounding. ---
    y_bf = biaffine_forward(x1, x2, w, out_features=out_features, bias=bias,
                            compute_dtype=jnp.bfloat16)
    jax.block_until_ready(y_bf)
    assert y_bf.shape == (B, L2, L1), y_bf.shape
    assert jnp.allclose(y_bf, y_ref, atol=5e-1, rtol=5e-2)

    print("KERNEL_OK")
</pallas_src>

<mosaic_0001>
module attributes {stable_mosaic.version = 11 : i64} {
  func.func @kernel(%arg0: i32, %arg1: memref<2x8x32xf32, #tpu.memory_space<vmem>>, %arg2: memref<2x12x32xf32, #tpu.memory_space<vmem>>, %arg3: memref<32x256xf32, #tpu.memory_space<vmem>>, %arg4: memref<1x256xf32, #tpu.memory_space<vmem>>, %arg5: memref<2x1x12x8xf32, #tpu.memory_space<vmem>>) attributes {dimension_semantics = [#tpu.dimension_semantics<parallel>], iteration_bounds = array<i64: 1>, scalar_prefetch = 0 : i64, scratch_operands = 0 : i64, tpu.core_type = #tpu.core_type<tc>, window_params = [{transform_indices = @transform_0, window_bounds = array<i64: 2, 8, 32>}, {transform_indices = @transform_1, window_bounds = array<i64: 2, 12, 32>}, {pipeline_mode = #tpu.pipeline_mode<synchronous>, transform_indices = @transform_2, window_bounds = array<i64: 32, 256>}, {pipeline_mode = #tpu.pipeline_mode<synchronous>, transform_indices = @transform_3, window_bounds = array<i64: 1, 256>}, {transform_indices = @transform_4, window_bounds = array<i64: 2, 1, 12, 8>}]} {
    %c0 = arith.constant 0 : index
    %c0_0 = arith.constant 0 : index
    %c0_1 = arith.constant 0 : index
    %0 = vector.load %arg1[%c0, %c0_0, %c0_1] : memref<2x8x32xf32, #tpu.memory_space<vmem>>, vector<2x8x32xf32>
    %c0_2 = arith.constant 0 : index
    %c0_3 = arith.constant 0 : index
    %c0_4 = arith.constant 0 : index
    %1 = vector.load %arg2[%c0_2, %c0_3, %c0_4] : memref<2x12x32xf32, #tpu.memory_space<vmem>>, vector<2x12x32xf32>
    %2 = vector.shape_cast %0 : vector<2x8x32xf32> to vector<16x32xf32>
    %c0_5 = arith.constant 0 : index
    %c0_6 = arith.constant 0 : index
    %3 = vector.load %arg3[%c0_5, %c0_6] : memref<32x256xf32, #tpu.memory_space<vmem>>, vector<32x256xf32>
    %cst = arith.constant dense<0.000000e+00> : vector<16x256xf32>
    %4 = tpu.matmul %2, %3, %cst {dimension_numbers = #tpu.dot_dimension_numbers<[1], [0], [0], [1], [0, 0, 1, 1], [], []>} : vector<16x32xf32>, vector<32x256xf32>, vector<16x256xf32> -> vector<16x256xf32>
    %c0_7 = arith.constant 0 : index
    %c0_8 = arith.constant 0 : index
    %5 = vector.load %arg4[%c0_7, %c0_8] : memref<1x256xf32, #tpu.memory_space<vmem>>, vector<1x256xf32>
    %6 = vector.broadcast %5 : vector<1x256xf32> to vector<16x256xf32>
    %7 = arith.addf %4, %6 : vector<16x256xf32>
    %8 = vector.extract_strided_slice %7 {offsets = [0, 0], sizes = [16, 32], strides = [1, 1]} : vector<16x256xf32> to vector<16x32xf32>
    %9 = vector.extract_strided_slice %7 {offsets = [0, 128], sizes = [16, 1], strides = [1, 1]} : vector<16x256xf32> to vector<16x1xf32>
    %10 = vector.shape_cast %8 : vector<16x32xf32> to vector<2x8x32xf32>
    "tpu.trace_start"() <{level = 10 : i32, message = "bmj,blj->bml"}> : () -> ()
    %cst_9 = arith.constant dense<0.000000e+00> : vector<2x12x8xf32>
    %11 = tpu.matmul %1, %10, %cst_9 {dimension_numbers = #tpu.dot_dimension_numbers<[2], [2], [1], [1], [0, 0, 0, 1, 1, 1], [0], [0]>} : vector<2x12x32xf32>, vector<2x8x32xf32>, vector<2x12x8xf32> -> vector<2x12x8xf32>
    "tpu.trace_stop"() : () -> ()
    %12 = vector.shape_cast %9 : vector<16x1xf32> to vector<2x1x8xf32>
    %13 = vector.broadcast %12 : vector<2x1x8xf32> to vector<2x12x8xf32>
    %14 = arith.addf %11, %13 : vector<2x12x8xf32>
    %c0_10 = arith.constant 0 : index
    %c0_11 = arith.constant 0 : index
    %c0_12 = arith.constant 0 : index
    %c0_13 = arith.constant 0 : index
    %15 = vector.load %arg5[%c0_10, %c0_11, %c0_12, %c0_13] : memref<2x1x12x8xf32, #tpu.memory_space<vmem>>, vector<2x1x12x8xf32>
    %16 = vector.shape_cast %15 : vector<2x1x12x8xf32> to vector<2x12x8xf32>
    %17 = vector.shape_cast %14 : vector<2x12x8xf32> to vector<2x1x12x8xf32>
    tpu.vector_store %arg5[%c0_10, %c0_11, %c0_12, %c0_13], %17 {strides = array<i32>} : memref<2x1x12x8xf32, #tpu.memory_space<vmem>>, vector<2x1x12x8xf32>,
    return
  }
  func.func @transform_0(%arg0: i32) -> (i32, i32, i32) {
    %c0_i32 = arith.constant 0 : i32
    %c0_i32_0 = arith.constant 0 : i32
    %c0_i32_1 = arith.constant 0 : i32
    return %arg0, %c0_i32, %c0_i32_0 : i32, i32, i32
  }
  func.func @transform_1(%arg0: i32) -> (i32, i32, i32) {
    %c0_i32 = arith.constant 0 : i32
    %c0_i32_0 = arith.constant 0 : i32
    %c0_i32_1 = arith.constant 0 : i32
    return %arg0, %c0_i32, %c0_i32_0 : i32, i32, i32
  }
  func.func @transform_2(%arg0: i32) -> (i32, i32) {
    %c0_i32 = arith.constant 0 : i32
    %c0_i32_0 = arith.constant 0 : i32
    %c0_i32_1 = arith.constant 0 : i32
    return %c0_i32, %c0_i32_0 : i32, i32
  }
  func.func @transform_3(%arg0: i32) -> (i32, i32) {
    %c0_i32 = arith.constant 0 : i32
    %c0_i32_0 = arith.constant 0 : i32
    %c0_i32_1 = arith.constant 0 : i32
    return %c0_i32, %c0_i32_0 : i32, i32
  }
  func.func @transform_4(%arg0: i32) -> (i32, i32, i32, i32) {
    %c0_i32 = arith.constant 0 : i32
    %c0_i32_0 = arith.constant 0 : i32
    %c0_i32_1 = arith.constant 0 : i32
    %c0_i32_2 = arith.constant 0 : i32
    return %arg0, %c0_i32, %c0_i32_0, %c0_i32_1 : i32, i32, i32, i32
  }
}

</mosaic_0001>

<bundles_post_ra>
// kernel: tpu_custom_call.1
= control target key start
LH: loop header
LB: loop body
LE: loop exit
PB: predicated region body
PF: predicated region fallthrough
CT: control target
= control target key end

     0   :  { %9 = vsyncpa [#allocation3], 0  ;;  %s256_s18 = smov [#allocation2]   ;;  %s257_s20 = smov 256   ;;  %s331_s0 = inlined_call_operand.vmem [shape: f32[2,8,32], index: 0, kind: input, shape index: {}]   ;;  %s332_s1 = inlined_call_operand.vmem [shape: f32[2,12,32], index: 1, kind: input, shape index: {}]   ;;  %s333_s2 = inlined_call_operand.hbm [shape: f32[32,256], index: 2, kind: input, shape index: {}]   ;;  %s334_s3 = inlined_call_operand.vmem [shape: f32[1,256], index: 3, kind: input, shape index: {}]   ;;  %s335_s4 = inlined_call_operand.vmem [shape: f32[2,1,12,8], index: 4, kind: output, shape index: {}]  }
   0x1   :  { %s18_s17 = sshll.u32 %s333_s2, 4  ;;  %s20_s19 = sshll.u32 %s256_s18, 4  ;;  %s19_s17 = int_to_ptr.hbm [resolvable:$true] %s18_s17  ;;  %s21_s19 = int_to_ptr.vmem [resolvable:$true] %s20_s19 }
   0x2   :  { %s258_s21 = smov 16  }
   0x3   :  { %26 = dma.hbm_to_vmem [thread:$0]  %s19_s17, 1024, %s21_s19, [#allocation3], %s257_s20, %s257_s20, %s258_s21  }
   0x4   :  { %254 = dma.done.wait [#allocation3], 1024  }
   0x5   :  { %255 = vsyncadd [#allocation3], 4294966272  ;;  %v45_v0 = vld [vmem:[#allocation2 + $0x30] sm:$0xff]  ;;  %v43_v1 = vld [vmem:[#allocation2 + $0x20] sm:$0xff]  ;;  %vm53_vm0 = vcmask 261120   ;;  %v259_v10 = vmov 0   ;;  %v110_v26 = vlaneseq }
   0x6   :  { %72 = vmatpush.msra.mxu0 %v45_v0  ;;  %v41_v2 = vld [vmem:[#allocation2 + $0x10] sm:$0xff]  ;;  %v46_v3 = vld [vmem:[#allocation2 + $0x38] sm:$0xff]  ;;  %v44_v4 = vld [vmem:[#allocation2 + $0x28] sm:$0xff]  ;;  %229 = vset.pattern.permute.xlu0 %v259_v10  ;;  %vm204_vm1 = vcmask 64512   ;;  %vm206_vm2 = vcmask 60416  }
   0x7   :  { %95 = vmatpush.msra.mxu1 %v46_v3  ;;  %v39_v5 = vld [vmem:[#allocation2] sm:$0xff]  ;;  %v42_v6 = vld [vmem:[#allocation2 + $0x18] sm:$0xff]  ;;  %v40_v8 = vld [vmem:[#allocation2 + $0x8] sm:$0xff]  ;;  %v111_v28 = vand.u32 127, %v110_v26 }
   0x8   :  { %73 = vmatpush.msra.mxu0 %v43_v1  ;;  %v33_v7 = vld [vmem:[%s331_s0] sm:$0xff]  ;;  %v34_v9 = vld [vmem:[%s331_s0 + $0x8] sm:$0xff]  ;;  %v37_v23 = vld [vmem:[%s332_s1 + $0x10] sm:$0xff] }
   0x9   :  { %96 = vmatpush.msra.mxu1 %v44_v4  ;;  %v47_v11 = vld [vmem:[%s334_s3] sm:$0x3]  ;;  %v36_v22 = vld [vmem:[%s332_s1 + $0x8] sm:$0xf]  ;;  %v38_v25 = vld [vmem:[%s332_s1 + $0x18] sm:$0xf] }
   0xa   :  { %74 = vmatpush.msra.mxu0 %v41_v2  ;;  %v49_v12 = vperm.slane %v47_v11, 0  ;;  %v50_v13 = vperm.slane %v47_v11, 1  ;;  %v35_v17 = vld [vmem:[%s332_s1] sm:$0xff] }
   0xb   :  { %97 = vmatpush.msra.mxu1 %v42_v6 }
   0xc   :  { %75 = vmatpush.msra.mxu0 %v39_v5 }
   0xd   :  { %215 = vmatmul.msk.f32.vlgmr.msra.gmra.mxu0 %vm53_vm0, %v33_v7  ;;  %98 = vmatpush.msra.mxu1 %v40_v8 }
   0xe   :  { %217 = vmatmul.msk.f32.vlgmr.msra.gmra.mxu1 %vm53_vm0, %v33_v7 }
  0x15   :  { %216 = vmatmul.msk.f32.gmra.mxu0 %vm53_vm0, %v34_v9 }
  0x16   :  { %218 = vmatmul.msk.f32.gmra.mxu1 %vm53_vm0, %v34_v9 }
  0x8a   :  { %v77_v14 = vpop.f32.mrf.mxu0 }
  0x8b   :  { %v78_v15 = vadd.f32 %v77_v14, %v49_v12  ;;  %v100_v16 = vpop.f32.mrf.mxu1 }
  0x8c   :  { %v101_v18 = vadd.f32 %v100_v16, %v50_v13 }
  0x8d   :  { %219 = vmatpush.xpose.msk.msra.mxu2 %vm53_vm0, %v78_v15 }
  0x8e   :  { %108 = vperm.xlu0 %229, %v101_v18  }
  0x90   :  { %220 = vmatmul.msk.f32.vlgmr.msra.gmra.mxu2 %vm53_vm0, %v35_v17 }
  0x92   :  { %v80_v19 = vpop.f32.mrf.mxu0 }
  0x93   :  { %v81_v20 = vadd.f32 %v80_v19, %v49_v12  ;;  %v103_v21 = vpop.f32.mrf.mxu1 }
  0x94   :  { %v104_v24 = vadd.f32 %v103_v21, %v50_v13 }
  0x95   :  { %222 = vmatpush.xpose.msk.msra.mxu3 %vm53_vm0, %v81_v20 }
  0x96   :  { %161 = vperm.xlu0 %229, %v104_v24  }
  0x98   :  { %221 = vmatmul.msk.f32.gmra.mxu2 %vm53_vm0, %v36_v22  ;;  %223 = vmatmul.msk.f32.vlgmr.msra.gmra.mxu3 %vm53_vm0, %v37_v23 }
  0xa0   :  { %224 = vmatmul.msk.f32.gmra.mxu3 %vm53_vm0, %v38_v25 }
 0x100   :  { %v109_v27 = vpop.permute.xlu0 %108 }
 0x101   :  { %v112_v29 = vperm.slane %v109_v27, %v111_v28 }
 0x108   :  { %v162_v32 = vpop.permute.xlu0 %161 }
 0x109   :  { %v163_v33 = vperm.slane %v162_v32, %v111_v28 }
 0x113   :  { %v153_v30 = vpop.f32.mrf.mxu2 }
 0x114   :  { %v154_v31 = vadd.f32 %v153_v30, %v112_v29 }
 0x116   :  { %205 = vst.msk [vmem:[%s335_s4] sm:$0xff] %vm204_vm1, %v154_v31 }
 0x11b   :  { %v156_v34 = vpop.f32.mrf.mxu2  ;;  %v198_v35 = vpop.f32.mrf.mxu3 }
 0x11c   :  { %v157_v36 = vadd.f32 %v156_v34, %v112_v29  ;;  %v199_v37 = vadd.f32 %v198_v35, %v163_v33 }
 0x11e   :  { %207 = vst.msk [vmem:[%s335_s4 + $0x8] sm:$0xf] %vm206_vm2, %v157_v36 }
 0x11f   :  { %208 = vst.msk [vmem:[%s335_s4 + $0x10] sm:$0xff] %vm204_vm1, %v199_v37 }
 0x123   :  { %v201_v38 = vpop.f32.mrf.mxu3 }
 0x124   :  { %v202_v39 = vadd.f32 %v201_v38, %v163_v33 }
 0x126   :  { %209 = vst.msk [vmem:[%s335_s4 + $0x18] sm:$0xf] %vm206_vm2, %v202_v39 }
 0x127   :  { %214 = vsyncpa [#allocation3], 1 }

</bundles_post_ra>
